<compile_context>
chip_gen: v7x
topology: tpu7x:2x2x1
jax: 0.10.0
libtpu: 0.0.40
codegen_flags: <defaults>
</compile_context>

<pallas_src>
import functools

import jax
import jax.numpy as jnp
from jax.experimental import pallas as pl
from jax.experimental.pallas import tpu as pltpu

_LANES = 128
_TARGET_BLOCK_BYTES = 4 * 1024 * 1024   # ~4 MiB per streamed input block
_VMEM_LIMIT_BYTES = 32 * 1024 * 1024    # covers v5e's 16 MiB scoped default


def _round_up(a, b):
    return ((a + b - 1) // b) * b


def _sublane_pack(dtype):
    # f32 -> 8 rows/vreg, bf16 -> 16, int8/fp8 -> 32.
    itemsize = jnp.dtype(dtype).itemsize
    return max(8, 32 // max(itemsize, 1))


def _quant_kernel(scale_ref, off_ref, x_ref, o_ref, *, qmax):
    # scale / round(offset) are SMEM scalars. True divide keeps torch's
    # round(x/scale) tie-breaking; the kernel is HBM-bound so it is free.
    x = x_ref[...].astype(jnp.float32)
    q = jnp.round(x / scale_ref[0]) - off_ref[0]
    o_ref[...] = jnp.clip(q, 0.0, qmax).astype(o_ref.dtype)


def _quantize_slab(xf, scale_f, off_r_f, qmax, pack):
    """Run the Pallas kernel over a (rows, 128) slab (rows % pack == 0)."""
    rows = xf.shape[0]
    itemsize = jnp.dtype(xf.dtype).itemsize

    # Target ~4 MiB blocks, aligned to the sublane pack factor.
    max_tile_rows = max(pack,
                        _round_up(_TARGET_BLOCK_BYTES // (_LANES * itemsize),
                                  pack))

    # Balanced split: near-equal steps, rounded up to an even step count so
    # v7x's two TensorCores get equal work (no-op cost on single-TC chips).
    steps = pl.cdiv(rows, max_tile_rows)
    if steps > 1 and steps % 2:
        steps += 1
    tile_rows = min(rows, _round_up(pl.cdiv(rows, steps), pack))
    grid = (pl.cdiv(rows, tile_rows),)

    kernel = functools.partial(_quant_kernel, qmax=qmax)
    return pl.pallas_call(
        kernel,
        out_shape=jax.ShapeDtypeStruct(xf.shape, xf.dtype),
        grid=grid,
        in_specs=[
            pl.BlockSpec(memory_space=pltpu.MemorySpace.SMEM),    # scale
            pl.BlockSpec(memory_space=pltpu.MemorySpace.SMEM),    # round(offset)
            pl.BlockSpec((tile_rows, _LANES), lambda i: (i, 0)),  # x tile
        ],
        out_specs=pl.BlockSpec((tile_rows, _LANES), lambda i: (i, 0)),
        compiler_params=pltpu.CompilerParams(
            dimension_semantics=("parallel",),
            vmem_limit_bytes=_VMEM_LIMIT_BYTES),
    )(scale_f, off_r_f, xf)


def autograd_quantize(x, scale, offset, bitwidth):
    """Pallas implementation of AutogradQuantizationModule.forward."""
    orig_shape = x.shape
    orig_dtype = x.dtype
    total = x.size
    qmax = float(2 ** bitwidth - 1)

    scale_f = jnp.asarray(scale, jnp.float32).reshape(1)
    off_r_f = jnp.round(jnp.asarray(offset, jnp.float32)).reshape(1)

    def _xla_quant(v):
        q = jnp.round(v.astype(jnp.float32) / scale_f[0]) - off_r_f[0]
        return jnp.clip(q, 0.0, qmax).astype(orig_dtype)

    pack = _sublane_pack(orig_dtype)
    chunk = pack * _LANES
    aligned = (total // chunk) * chunk

    if aligned == 0:
        # Tiny ragged tensor: one trivial XLA op beats any kernel launch.
        return _xla_quant(x)

    xflat = x.reshape(-1)
    if aligned == total:
        xf = xflat.reshape(total // _LANES, _LANES)       # pure reshape, no copy
    else:
        xf = xflat[:aligned].reshape(aligned // _LANES, _LANES)

    out = _quantize_slab(xf, scale_f, off_r_f, qmax, pack).reshape(-1)

    if aligned != total:
        # Ragged tail (< pack*128 elements) handled by a trivial XLA op
        # instead of pad + full-tensor slice (saves a full HBM read+write).
        out = jnp.concatenate([out, _xla_quant(xflat[aligned:])])

    return out.reshape(orig_shape)


def _reference(x, scale, offset, bitwidth):
    return jnp.clip(
        jnp.round(x.astype(jnp.float32) / jnp.float32(scale))
        - jnp.round(jnp.float32(offset)),
        0.0, float(2 ** bitwidth - 1)).astype(x.dtype)


if __name__ == "__main__":
    key = jax.random.PRNGKey(0)
    kx, koff, kx2 = jax.random.split(key, 3)

    # Small NCHW activation tensor consistent with the module under test.
    x = jax.random.normal(kx, (2, 4, 16, 16), dtype=jnp.float32) * 4.0

    # Deterministic scalar parameters (per module __init__ / offset fixture).
    scale = jnp.float32(0.125)
    offset = jax.random.randint(koff, (), -5, 5).astype(jnp.float32)
    bitwidth = 8

    out = autograd_quantize(x, scale, offset, bitwidth)
    jax.block_until_ready(out)

    ref = _reference(x, scale, offset, bitwidth)
    assert out.shape == x.shape and out.dtype == x.dtype
    assert jnp.array_equal(out, ref), "mismatch vs reference (aligned path)"

    # Ragged-size smoke test: aligned Pallas prefix + XLA tail path.
    x2 = jax.random.normal(kx2, (5, 301), dtype=jnp.float32) * 4.0
    out2 = autograd_quantize(x2, scale, offset, bitwidth)
    jax.block_until_ready(out2)
    assert out2.shape == x2.shape and out2.dtype == x2.dtype
    assert jnp.array_equal(out2, _reference(x2, scale, offset, bitwidth)), \
        "mismatch vs reference (ragged path)"

    print("KERNEL_OK")
</pallas_src>

<mosaic_0001>
module attributes {stable_mosaic.version = 11 : i64} {
  func.func @_quant_kernel(%arg0: i32, %arg1: memref<1xf32, #tpu.memory_space<smem>>, %arg2: memref<1xf32, #tpu.memory_space<smem>>, %arg3: memref<16x128xf32, #tpu.memory_space<vmem>>, %arg4: memref<16x128xf32, #tpu.memory_space<vmem>>) attributes {dimension_semantics = [#tpu.dimension_semantics<parallel>], iteration_bounds = array<i64: 1>, scalar_prefetch = 0 : i64, scratch_operands = 0 : i64, tpu.core_type = #tpu.core_type<tc>, window_params = [{transform_indices = @transform_0, window_bounds = array<i64: 1>}, {transform_indices = @transform_1, window_bounds = array<i64: 1>}, {transform_indices = @transform_2, window_bounds = array<i64: 16, 128>}, {transform_indices = @transform_3, window_bounds = array<i64: 16, 128>}]} {
    %c0 = arith.constant 0 : index
    %c0_0 = arith.constant 0 : index
    %0 = vector.load %arg3[%c0, %c0_0] : memref<16x128xf32, #tpu.memory_space<vmem>>, vector<16x128xf32>
    %c0_1 = arith.constant 0 : index
    %1 = memref.load %arg1[%c0_1] : memref<1xf32, #tpu.memory_space<smem>>
    %2 = vector.broadcast %1 : f32 to vector<16x128xf32>
    %3 = arith.divf %0, %2 : vector<16x128xf32>
    %4 = math.roundeven %3 : vector<16x128xf32>
    %c0_2 = arith.constant 0 : index
    %5 = memref.load %arg2[%c0_2] : memref<1xf32, #tpu.memory_space<smem>>
    %6 = vector.broadcast %5 : f32 to vector<16x128xf32>
    %7 = arith.subf %4, %6 : vector<16x128xf32>
    %cst = arith.constant 0.000000e+00 : f32
    %cst_3 = arith.constant 2.550000e+02 : f32
    %8 = vector.broadcast %cst : f32 to vector<16x128xf32>
    %9 = arith.maximumf %8, %7 : vector<16x128xf32>
    %10 = vector.broadcast %cst_3 : f32 to vector<16x128xf32>
    %11 = arith.minimumf %10, %9 : vector<16x128xf32>
    %c0_4 = arith.constant 0 : index
    %c0_5 = arith.constant 0 : index
    %12 = vector.load %arg4[%c0_4, %c0_5] : memref<16x128xf32, #tpu.memory_space<vmem>>, vector<16x128xf32>
    tpu.vector_store %arg4[%c0_4, %c0_5], %11 {strides = array<i32>} : memref<16x128xf32, #tpu.memory_space<vmem>>, vector<16x128xf32>,
    return
  }
  func.func @transform_0(%arg0: i32) -> i32 {
    %c0_i32 = arith.constant 0 : i32
    %c0_i32_0 = arith.constant 0 : i32
    return %c0_i32 : i32
  }
  func.func @transform_1(%arg0: i32) -> i32 {
    %c0_i32 = arith.constant 0 : i32
    %c0_i32_0 = arith.constant 0 : i32
    return %c0_i32 : i32
  }
  func.func @transform_2(%arg0: i32) -> (i32, i32) {
    %c0_i32 = arith.constant 0 : i32
    %c0_i32_0 = arith.constant 0 : i32
    return %arg0, %c0_i32 : i32, i32
  }
  func.func @transform_3(%arg0: i32) -> (i32, i32) {
    %c0_i32 = arith.constant 0 : i32
    %c0_i32_0 = arith.constant 0 : i32
    return %arg0, %c0_i32 : i32, i32
  }
}

</mosaic_0001>

<bundles_post_ra>
// kernel: tpu_custom_call.1
= control target key start
LH: loop header
LB: loop body
LE: loop exit
PB: predicated region body
PF: predicated region fallthrough
CT: control target
= control target key end

     0   :  { %10 = vsyncpa [#allocation5], 0  ;;  %s183_s0 = inlined_call_operand.<no memory space> [shape: f32[1], index: 0, kind: input, shape index: {}]   ;;  %s184_s1 = inlined_call_operand.<no memory space> [shape: f32[1], index: 1, kind: input, shape index: {}]   ;;  %s185_s2 = inlined_call_operand.hbm [shape: f32[16,128], index: 2, kind: input, shape index: {}]   ;;  %s186_s3 = inlined_call_operand.hbm [shape: f32[16,128], index: 3, kind: output, shape index: {}]  }
   0x1   :  { %11 = vsyncpa [#allocation6], 0  ;;  %s123_s12 = smov [#allocation4]   ;;  %s75_s16 = scalar_lea.hbm %s185_s2, 256 }
   0x2   :  { %s21_s13 = sshll.u32 %s123_s12, 4  ;;  %p76_p0 = scmp.ne.s32.totalorder %s185_s2, %s75_s16  ;;  %s22_s13 = int_to_ptr.vmem [resolvable:$true] %s21_s13 }
   0x3   :  { %p79_p1 = scmp.lt.u32.totalorder %s75_s16, %s185_s2 }
   0x5   :  { %p81_p2 = pnand %p79_p1, %p76_p0 }
   0x7   :  { %84 = shalt.err (!%p81_p2)
}
   0x8   :  { %s85_s21 = scalar_lea.vmem %s22_s13, 256  ;;  %p90_p4 = scmp.lt.s32.totalorder %s22_s13, %s22_s13 }
   0x9   :  { %p86_p3 = scmp.ne.s32.totalorder %s22_s13, %s85_s21  ;;  %p91_p5 = scmp.lt.s32.totalorder %s85_s21, %s85_s21 }
   0xb   :  { %p92_p6 = por %p91_p5, %p90_p4 }
   0xd   :  { %p93_p7 = pnand %p92_p6, %p86_p3 }
   0xf   :  { %96 = shalt.err (!%p93_p7)
}
  0x10   :  { %s124_s22 = smov 128   ;;  %s125_s23 = smov 8  }
  0x11   :  { %27 = dma.hbm_to_vmem [thread:$0]  %s185_s2, 256, %s22_s13, [#allocation5], %s124_s22, %s124_s22, %s125_s23  }
  0x12   :  { %119 = dma.done.wait [#allocation5], 256  }
  0x13   :  { %120 = vsyncadd [#allocation5], 4294967040  ;;  %v34_v0 = vstv %s183_s0  ;;  %v31_v1 = vld [vmem:[#allocation4] sm:$0xff]  ;;  %v32_v2 = vld [vmem:[#allocation4 + $0x8] sm:$0xff]  ;;  %v41_v6 = vstv %s184_s1  ;;  %s126_s2 = smov [#allocation7]  }
  0x14   :  { %73 = vrcp.f32 %v34_v0  ;;  %s55_s30 = sshll.u32 %s126_s2, 4  ;;  %s56_s30 = int_to_ptr.vmem [resolvable:$true] %s55_s30 }
  0x15   :  { %s97_s0 = scalar_lea.vmem %s56_s30, 256  ;;  %p102_p9 = scmp.lt.s32.totalorder %s56_s30, %s56_s30 }
  0x16   :  { %p98_p8 = scmp.ne.s32.totalorder %s56_s30, %s97_s0  ;;  %p103_p10 = scmp.lt.s32.totalorder %s97_s0, %s97_s0 }
  0x18   :  { %p104_p11 = por %p103_p10, %p102_p9 }
  0x1a   :  { %p105_p12 = pnand %p104_p11, %p98_p8 }
  0x1e   :  { %v74_v3 = vpop.eup %73 }
  0x1f   :  { %v36_v4 = vmul.f32 %v74_v3, %v31_v1  ;;  %v37_v5 = vmul.f32 %v74_v3, %v32_v2 }
  0x21   :  { %v67_v7 = vround.rtne.f32 %v36_v4  ;;  %v68_v8 = vround.rtne.f32 %v37_v5 }
  0x23   :  { %v42_v9 = vsub.f32 %v67_v7, %v41_v6  ;;  %v43_v10 = vsub.f32 %v68_v8, %v41_v6 }
  0x25   :  { %v44_v11 = vmax.f32 %v42_v9, 0.0  ;;  %v45_v12 = vmax.f32 %v43_v10, 0.0 }
  0x27   :  { %v46_v13 = vmin.f32 %v44_v11, 255.0  ;;  %v47_v14 = vmin.f32 %v45_v12, 255.0 }
  0x29   :  { %48 = vst [vmem:[#allocation7] sm:$0xff] %v46_v13  ;;  %49 = vst [vmem:[#allocation7 + $0x8] sm:$0xff] %v47_v14 }
  0x2a   :  { %108 = shalt.err (!%p105_p12)
}
  0x2b   :  { %s109_s5 = scalar_lea.hbm %s186_s3, 256 }
  0x2c   :  { %p110_p13 = scmp.ne.s32.totalorder %s186_s3, %s109_s5  ;;  %p113_p0 = scmp.lt.u32.totalorder %s109_s5, %s186_s3 }
  0x2e   :  { %p115_p1 = pnand %p113_p0, %p110_p13 }
  0x30   :  { %118 = shalt.err (!%p115_p1)
}
  0x31   :  { %61 = dma.vmem_to_hbm [thread:$0]  %s56_s30, 256, %s186_s3, [#allocation6], %s124_s22, %s124_s22, %s125_s23  }
  0x32   :  { %121 = dma.done.wait [#allocation6], 256  }
  0x33   :  { %122 = vsyncadd [#allocation6], 4294967040 }
  0x34   :  { %65 = vsyncpa [#allocation5], 1 }
  0x35   :  { %66 = vsyncpa [#allocation6], 1 }

</bundles_post_ra>
